<compile_context>
chip_gen: v6e
topology: v6e:2x2x1
jax: 0.10.0
libtpu: 0.0.40
codegen_flags: <defaults>
</compile_context>

<pallas_src>
import jax
import jax.numpy as jnp
from jax.experimental import pallas as pl
from jax.experimental.pallas import tpu as pltpu


_LANE = 128
_TN_SPILL_CAP = 8192  # spill insurance on the (C_out, tn) f32 epilogue (review #8)


# ---------------------------------------------------------------------------
# Pallas kernel:  for each batch element in the block,
#     (C_out, K) @ (K, tn) + bias(C_out, 1)  ->  (C_out, tn)
# Spatial tile tn is the lane axis -> lane-dense stores.
# ---------------------------------------------------------------------------
def _conv2x2_kernel(w_ref, b_ref, p_ref, o_ref):
    w = w_ref[...]
    b = b_ref[...].astype(jnp.float32)
    # Small static (unrolled) loop over the batch block: each iteration is an
    # independent lane-dense (C_out, K) @ (K, tn) MXU matmul + f32 bias add.
    for i in range(p_ref.shape[0]):
        acc = jnp.dot(w, p_ref[i], preferred_element_type=jnp.float32)
        o_ref[i] = (acc + b).astype(o_ref.dtype)


# ---------------------------------------------------------------------------
# Generation-aware VMEM sizing (review #3)
# ---------------------------------------------------------------------------
def _vmem_config():
    """Return (vmem_limit_bytes, per-step tile budget).

    v7x has 64 MiB physical VMEM per TensorCore, v5e/v6e have 128 MiB; use
    ~3/4 of physical (capped) as the scoped limit and ~3/8 as the budget for
    the double-buffered pipelined blocks.
    """
    try:
        cap = int(pltpu.get_tpu_info().vmem_capacity_bytes)
    except Exception:
        cap = 64 << 20  # conservative (v7x-sized) fallback
    limit = min((cap * 3) // 4, 100 << 20)
    budget = (cap * 3) // 8
    return limit, budget


# ---------------------------------------------------------------------------
# Tile selection (reviews #1, #5, #6, #8)
# ---------------------------------------------------------------------------
def _pick_tiles(B, S, K, C_out, itemsize, tile_budget):
    """Pick (batch_block, spatial_tile).

    The spatial tile tn (lane axis) is VMEM-budget derived, preferring a
    full-S block, capped at _TN_SPILL_CAP.  When full-S blocks are cheap and
    the batch is large, several batch elements are packed per grid step to
    amortize the ~0.35 us fixed per-step overhead.  At least 2 grid steps are
    kept whenever possible so both v7x TensorCores get work.
    """
    resident = itemsize * (K * C_out + C_out)  # single-buffered weight + bias

    def step_bytes(bblk, tn):
        # double-buffered patches-in + out blocks, plus resident operands
        return 2 * itemsize * bblk * (K + C_out) * tn + resident

    # ---- spatial tile ----------------------------------------------------
    if S <= _TN_SPILL_CAP and step_bytes(1, S) <= tile_budget:
        tn = S  # full-extent block (always a legal shape)
    else:
        tn = min(S, _TN_SPILL_CAP)
        tn -= tn % _LANE  # keep the lane dim 128-aligned
        while tn > _LANE and step_bytes(1, tn) > tile_budget:
            tn -= _LANE
        tn = max(tn, _LANE)
        if tn >= S:
            tn = S

    # ---- batch block (only when a whole image's patches fit per step) ----
    bblk = 1
    if tn == S and B >= 4:
        cap = min(B // 2, 16)  # keep >=2 batch grid steps, bound unroll size
        for cand in range(cap, 1, -1):
            if B % cand == 0 and step_bytes(cand, S) <= tile_budget:
                bblk = cand
                break

    # ---- guarantee >=2 grid steps when possible (megacore, review #5) ----
    if (B // bblk) * pl.cdiv(S, tn) < 2 and tn == S and S > _LANE:
        half = (((S + 1) // 2) + _LANE - 1) // _LANE * _LANE
        if half < S:
            tn = half

    return bblk, tn


# ---------------------------------------------------------------------------
# AlternativeDownsample forward (method='conv')
# ---------------------------------------------------------------------------
def alternative_downsample_conv(x_nchw, weight, bias):
    """x_nchw: [B, C_in, H, W]; weight: [C_out, C_in, 2, 2]; bias: [C_out].
    Returns [B, C_out, H//2, W//2]  ==  nn.Conv2d(C_in, C_out, 2, stride=2)."""
    B, C_in, H, W = x_nchw.shape
    C_out = weight.shape[0]
    Ho, Wo = H // 2, W // 2
    K = C_in * 4
    S = Ho * Wo

    # Space-to-depth, K-major / spatial-last:
    #   patches[b, ci*4 + kh*2 + kw, ho*Wo + wo] = x[b, ci, 2*ho+kh, 2*wo+kw]
    # Single XLA transpose on the input; both reshapes are free.
    xr = x_nchw[:, :, : 2 * Ho, : 2 * Wo].reshape(B, C_in, Ho, 2, Wo, 2)
    patches = jnp.transpose(xr, (0, 1, 3, 5, 2, 4)).reshape(B, K, S)

    # weight [C_out, C_in, 2, 2] -> [C_out, K]; matmul runs in the input dtype
    # (bf16 inputs -> bf16-native MXU on v6e/v7x), accumulation stays f32.
    w_mat = weight.reshape(C_out, K).astype(x_nchw.dtype)
    b_col = bias.reshape(C_out, 1).astype(jnp.float32)

    itemsize = jnp.dtype(x_nchw.dtype).itemsize
    vmem_limit, tile_budget = _vmem_config()
    Bblk, tn = _pick_tiles(B, S, K, C_out, itemsize, tile_budget)
    grid = (B // Bblk, pl.cdiv(S, tn))

    cost = pl.CostEstimate(
        flops=2 * B * C_out * K * S,
        transcendentals=0,
        bytes_accessed=int(
            itemsize * B * (K + C_out) * S
            + w_mat.size * w_mat.dtype.itemsize
            + b_col.size * b_col.dtype.itemsize
        ),
    )

    out_flat = pl.pallas_call(
        _conv2x2_kernel,
        out_shape=jax.ShapeDtypeStruct((B, C_out, S), x_nchw.dtype),
        grid_spec=pltpu.PrefetchScalarGridSpec(
            num_scalar_prefetch=0,
            grid=grid,
            in_specs=[
                # Resident operands: constant index_map -> single-buffered.
                pl.BlockSpec((C_out, K), lambda b, j: (0, 0),
                             pipeline_mode=pl.Buffered(1)),
                pl.BlockSpec((C_out, 1), lambda b, j: (0, 0),
                             pipeline_mode=pl.Buffered(1)),
                # Patches tile: Bblk batch elems x full K x tn lanes.
                pl.BlockSpec((Bblk, K, tn), lambda b, j: (b, 0, j)),
            ],
            out_specs=pl.BlockSpec((Bblk, C_out, tn), lambda b, j: (b, 0, j)),
        ),
        compiler_params=pltpu.CompilerParams(
            dimension_semantics=("parallel", "parallel"),
            vmem_limit_bytes=vmem_limit,
        ),
        cost_estimate=cost,
    )(w_mat, b_col, patches)

    # [B, C_out, S] -> [B, C_out, Ho, Wo]: free reshape, no transpose needed.
    return out_flat.reshape(B, C_out, Ho, Wo)


# ---------------------------------------------------------------------------
# Pure-JAX reference (for verification)
# ---------------------------------------------------------------------------
def _ref_conv(x_nchw, weight, bias):
    y = jax.lax.conv_general_dilated(
        x_nchw, weight,
        window_strides=(2, 2), padding="VALID",
        dimension_numbers=("NCHW", "OIHW", "NCHW"),
    )
    return y + bias.reshape(1, -1, 1, 1)


def _make_params(key, C_in, C_out):
    kw, kb = jax.random.split(key)
    # nn.Conv2d default init: U(-bound, bound), bound = 1/sqrt(fan_in)
    fan_in = C_in * 2 * 2
    bound = 1.0 / (fan_in ** 0.5)
    weight = jax.random.uniform(kw, (C_out, C_in, 2, 2),
                                minval=-bound, maxval=bound, dtype=jnp.float32)
    bias = jax.random.uniform(kb, (C_out,),
                              minval=-bound, maxval=bound, dtype=jnp.float32)
    return weight, bias


if __name__ == "__main__":
    key = jax.random.PRNGKey(0)
    k1, k2, k3, k4 = jax.random.split(key, 4)

    fwd = jax.jit(alternative_downsample_conv)

    # --- test 1: spec shapes -------------------------------------------------
    B, C_in, H, W, C_out = 2, 4, 16, 16, 8
    x = jax.random.normal(k1, (B, C_in, H, W), dtype=jnp.float32)
    weight, bias = _make_params(k2, C_in, C_out)
    y = jax.block_until_ready(fwd(x, weight, bias))
    y_ref = _ref_conv(x, weight, bias)
    assert y.shape == (B, C_out, H // 2, W // 2), y.shape
    assert jnp.allclose(y, y_ref, atol=1e-5, rtol=1e-5), \
        float(jnp.max(jnp.abs(y - y_ref)))

    # --- test 2: odd spatial dims, B=1 (exercises slicing + full-S block) ---
    B2, C_in2, H2, W2, C_out2 = 1, 3, 10, 14, 16
    x2 = jax.random.normal(k3, (B2, C_in2, H2, W2), dtype=jnp.float32)
    weight2, bias2 = _make_params(k4, C_in2, C_out2)
    y2 = jax.block_until_ready(fwd(x2, weight2, bias2))
    y2_ref = _ref_conv(x2[:, :, : 2 * (H2 // 2), : 2 * (W2 // 2)], weight2, bias2)
    assert y2.shape == (B2, C_out2, H2 // 2, W2 // 2), y2.shape
    assert jnp.allclose(y2, y2_ref, atol=1e-5, rtol=1e-5), \
        float(jnp.max(jnp.abs(y2 - y2_ref)))

    print("KERNEL_OK")
</pallas_src>

<mosaic_0001>
module attributes {stable_mosaic.version = 11 : i64} {
  func.func @_conv2x2_kernel(%arg0: i32, %arg1: i32, %arg2: memref<8x16xf32, #tpu.memory_space<vmem>>, %arg3: memref<8x1xf32, #tpu.memory_space<vmem>>, %arg4: memref<1x16x64xf32, #tpu.memory_space<vmem>>, %arg5: memref<1x8x64xf32, #tpu.memory_space<vmem>>) attributes {dimension_semantics = [#tpu.dimension_semantics<parallel>, #tpu.dimension_semantics<parallel>], iteration_bounds = array<i64: 2, 1>, scalar_prefetch = 0 : i64, scratch_operands = 0 : i64, tpu.core_type = #tpu.core_type<tc>, window_params = [{pipeline_mode = #tpu.pipeline_mode<synchronous>, transform_indices = @transform_0, window_bounds = array<i64: 8, 16>}, {pipeline_mode = #tpu.pipeline_mode<synchronous>, transform_indices = @transform_1, window_bounds = array<i64: 8, 1>}, {transform_indices = @transform_2, window_bounds = array<i64: 1, 16, 64>}, {transform_indices = @transform_3, window_bounds = array<i64: 1, 8, 64>}]} {
    %c0 = arith.constant 0 : index
    %c0_0 = arith.constant 0 : index
    %0 = vector.load %arg2[%c0, %c0_0] : memref<8x16xf32, #tpu.memory_space<vmem>>, vector<8x16xf32>
    %c0_1 = arith.constant 0 : index
    %c0_2 = arith.constant 0 : index
    %1 = vector.load %arg3[%c0_1, %c0_2] : memref<8x1xf32, #tpu.memory_space<vmem>>, vector<8x1xf32>
    %c0_3 = arith.constant 0 : index
    %c0_4 = arith.constant 0 : index
    %c0_5 = arith.constant 0 : index
    %2 = vector.load %arg4[%c0_3, %c0_4, %c0_5] : memref<1x16x64xf32, #tpu.memory_space<vmem>>, vector<1x16x64xf32>
    %3 = vector.shape_cast %2 : vector<1x16x64xf32> to vector<16x64xf32>
    %cst = arith.constant dense<0.000000e+00> : vector<8x64xf32>
    %4 = tpu.matmul %0, %3, %cst {dimension_numbers = #tpu.dot_dimension_numbers<[1], [0], [0], [1], [0, 0, 1, 1], [], []>} : vector<8x16xf32>, vector<16x64xf32>, vector<8x64xf32> -> vector<8x64xf32>
    %5 = vector.broadcast %1 : vector<8x1xf32> to vector<8x64xf32>
    %6 = arith.addf %4, %5 : vector<8x64xf32>
    %c0_6 = arith.constant 0 : index
    %c0_7 = arith.constant 0 : index
    %c0_8 = arith.constant 0 : index
    %7 = vector.load %arg5[%c0_6, %c0_7, %c0_8] : memref<1x8x64xf32, #tpu.memory_space<vmem>>, vector<1x8x64xf32>
    %8 = vector.shape_cast %7 : vector<1x8x64xf32> to vector<8x64xf32>
    %9 = vector.shape_cast %6 : vector<8x64xf32> to vector<1x8x64xf32>
    tpu.vector_store %arg5[%c0_6, %c0_7, %c0_8], %9 {strides = array<i32>} : memref<1x8x64xf32, #tpu.memory_space<vmem>>, vector<1x8x64xf32>,
    return
  }
  func.func @transform_0(%arg0: i32, %arg1: i32) -> (i32, i32) {
    %c0_i32 = arith.constant 0 : i32
    %c0_i32_0 = arith.constant 0 : i32
    %c0_i32_1 = arith.constant 0 : i32
    return %c0_i32, %c0_i32_0 : i32, i32
  }
  func.func @transform_1(%arg0: i32, %arg1: i32) -> (i32, i32) {
    %c0_i32 = arith.constant 0 : i32
    %c0_i32_0 = arith.constant 0 : i32
    %c0_i32_1 = arith.constant 0 : i32
    return %c0_i32, %c0_i32_0 : i32, i32
  }
  func.func @transform_2(%arg0: i32, %arg1: i32) -> (i32, i32, i32) {
    %c0_i32 = arith.constant 0 : i32
    %c0_i32_0 = arith.constant 0 : i32
    return %arg0, %c0_i32, %arg1 : i32, i32, i32
  }
  func.func @transform_3(%arg0: i32, %arg1: i32) -> (i32, i32, i32) {
    %c0_i32 = arith.constant 0 : i32
    %c0_i32_0 = arith.constant 0 : i32
    return %arg0, %c0_i32, %arg1 : i32, i32, i32
  }
}

</mosaic_0001>

<bundles_post_ra>
// kernel: alternative_downsample_conv.1
= control target key start
LH: loop header
LB: loop body
LE: loop exit
PB: predicated region body
PF: predicated region fallthrough
CT: control target
= control target key end

     0   :  { %s459_s12 = smov 0   ;;  %s461_s13 = smov 0   ;;  %s498_s0 = inlined_call_operand.vmem [shape: f32[8,16], index: 0, kind: input, shape index: {}]   ;;  %s499_s1 = inlined_call_operand.vmem [shape: f32[8,1], index: 1, kind: input, shape index: {}]   ;;  %s500_s2 = inlined_call_operand.vmem [shape: f32[2,16,64], index: 2, kind: input, shape index: {}]   ;;  %s501_s3 = inlined_call_operand.vmem [shape: f32[2,8,64], index: 3, kind: output, shape index: {}]  }
   0x1   :  { %s463_s14 = smov 0  }
   0x2 LB: > { %s25_s15 = sadd.s32 1, %s430_s13  ;;  %p366_p0 = scmp.ge.s32.totalorder %s434_s14, 1  ;;  %s434_s14 = sphi %s463_s14, %s13_s14   ;;  %s430_s13 = sphi %s461_s13, %s503_s13   ;;  %s426_s12 = sphi %s459_s12, %s502_s12  }
   0x3   : > { %p27_p1 = scmp.ge.s32.totalorder %s25_s15, 2  ;;  %p156_p2 = scmp.lt.s32.totalorder %s434_s14, 3 }
   0x5   : > { %s505_s15 = smov (%p27_p1, %s25_s15), 0  ;;  %p157_p3 = pnand %p366_p0, %p156_p2 }
   0x6   : > { %p185_p4 = scmp.lt.s32.totalorder (!%p157_p3), %s426_s12, 1 }
   0x7   : > { %160 = sbr.rel (%p157_p3) target bundleno = 215 (0xd7), region = 32 }
   0xc   : > { %v436_v0 = vmov 0.0   ;;  %vm437_vm0 = vmmov 0   ;;  %v201_v1 = vld [vmem:[%s499_s1] sm:$0xff]  ;;  %s507_s12 = smov (!%p185_p4, %s426_s12), 1  ;;  %v438_v2 = vmov 0   ;;  %vm209_vm1 = vcmask 130048  }
   0xd   : > { %377 = vmatprep.subr.mxu0 %v436_v0  ;;  %381 = vmatprep.mubr.msk.f32.mxu0 %vm437_vm0, %v436_v0  ;;  %s373_s18 = sshll.u32 %s507_s12, 4  ;;  %v200_v5 = vld [vmem:[%s498_s0] sm:$0xff]  ;;  %s369_s24 = sshll.u32 %s507_s12, 3  ;;  %vm283_vm2 = vcmask 523264  }
   0xe   : > { %411 = vset.pattern.permute.xlu0 %v438_v2  ;;  %s192_s21 = scalar_lea.vmem %s500_s2, %s373_s18  ;;  %s199_s27 = scalar_lea.vmem %s501_s3, %s369_s24 }
   0xf   : > { %206 = vperm.xlu0 %411, %v201_v1   ;;  %v203_v3 = vld [vmem:[%s192_s21 + $0x8] sm:$0xff]  ;;  %v202_v4 = vld [vmem:[%s192_s21] sm:$0xff] }
  0x10   : > { %378 = vmatpush3.msra.mxu0 %v203_v3 }
  0x11   : > { %379 = vmatprep.subr.mxu0 %v436_v0 }
  0x12   : > { %380 = vmatpush3.msra.mxu0 %v202_v4 }
  0x13   : > { %382 = vmatmul.mubr.msk.f32.vlgmr.msra.gmra.mxu0 %vm209_vm1, %v200_v5 }
  0x8a   : > { %v207_v6 = vpop.permute.xlu0 %206 }
  0xd3   : > { %v279_v7 = vpop.f32.mrf.mxu0 }
  0xd4   : > { %v280_v8 = vadd.f32 %v279_v7, %v207_v6 }
  0xd5   : > { %v383_v9 = vpop.f32.mrf.mxu0 }
  0xd6   : > { %284 = vst.msk [vmem:[%s199_s27] sm:$0xff] %vm283_vm2, %v280_v8 }
  0xd7 PF: > { %s13_s14 = sadd.s32 1, %s434_s14   ;;  %s502_s12 = smov %s430_s13 }
  0xd8   : > { %p10_p5 = scmp.ge.s32.totalorder %s13_s14, 4   ;;  %s503_s13 = smov %s505_s15 }
  0xda   :  { %12 = sbr.rel (!%p10_p5) target bundleno = 2 (0x2), region = 62 }

</bundles_post_ra>
